<compile_context>
chip_gen: v6e
topology: v6e:2x2x1
jax: 0.10.0
libtpu: 0.0.40
codegen_flags: <defaults>
</compile_context>

<pallas_src>
import functools
import math

import jax
import jax.numpy as jnp
from jax.experimental import pallas as pl
from jax.experimental.pallas import tpu as pltpu

D_IN = 6
H = 20
D_OUT = 8

_LANE = 128          # lane granularity: batch is padded to a multiple of this
_MAX_TILE_B = 1024   # tile sweeps plateau by ~512-1024 columns


def _round_up(n, m):
    return ((n + m - 1) // m) * m


def _pick_tile_b(b_pad, max_tile=_MAX_TILE_B):
    """Largest lane-multiple tile that divides b_pad and is <= max_tile,
    preferring >= 2 grid steps (feeds both TensorCores on v7x)."""
    k = b_pad // _LANE
    divisors = [d for d in range(1, k + 1) if k % d == 0 and _LANE * d <= max_tile]
    multi = [d for d in divisors if k // d >= 2]
    pool = multi if multi else divisors
    return _LANE * max(pool)


def ffnnc_kernel(x_ref, w1_ref, b1_ref, w2_ref, b2_ref, w3_ref, b3_ref, o_ref):
    # x_ref:  [D_IN, TILE_B] bf16   (batch on the lane axis)
    # wN_ref: [out, in] bf16        bN_ref: [out, 1] f32
    # o_ref:  [D_OUT, TILE_B] bf16  (lane-dense output store)
    xt = x_ref[...]
    b1 = b1_ref[...]
    b2 = b2_ref[...]
    b3 = b3_ref[...]
    # Layer 1: bf16 MXU matmul, f32 accumulate; bias-add + tanh in f32 (VPU/EUP).
    h1 = jnp.tanh(
        jnp.dot(w1_ref[...], xt, preferred_element_type=jnp.float32) + b1
    ).astype(jnp.bfloat16)
    # Layer 2.
    h2 = jnp.tanh(
        jnp.dot(w2_ref[...], h1, preferred_element_type=jnp.float32) + b2
    ).astype(jnp.bfloat16)
    # Layer 3 (no activation).
    out = jnp.dot(w3_ref[...], h2, preferred_element_type=jnp.float32) + b3
    o_ref[...] = out.astype(o_ref.dtype)


def _cast_params(params):
    """bf16 matmul operands, f32 biases (tiny arrays; fused under jit)."""
    return dict(
        w1t=params["w1t"].astype(jnp.bfloat16),
        w2t=params["w2t"].astype(jnp.bfloat16),
        w3t=params["w3t"].astype(jnp.bfloat16),
        b1=params["b1"].astype(jnp.float32),
        b2=params["b2"].astype(jnp.float32),
        b3=params["b3"].astype(jnp.float32),
    )


def _ffnnc_core(xt, pp, tile_b, max_tile):
    """xt: [D_IN, b_pad] bf16 (b_pad % 128 == 0). Returns [D_OUT, b_pad] bf16."""
    d_in, b_pad = xt.shape
    assert d_in == D_IN and b_pad % _LANE == 0
    if tile_b is None:
        tile_b = _pick_tile_b(b_pad, max_tile)
    assert b_pad % tile_b == 0 and tile_b % _LANE == 0
    n_tiles = b_pad // tile_b

    weight_bytes = 2 * (D_IN * H + H * H + H * D_OUT) + 4 * (H + H + D_OUT)
    cost = pl.CostEstimate(
        flops=2 * (D_IN * H + H * H + H * D_OUT) * b_pad,
        transcendentals=2 * H * b_pad,
        bytes_accessed=2 * (D_IN + D_OUT) * b_pad + weight_bytes,
    )

    return pl.pallas_call(
        ffnnc_kernel,
        out_shape=jax.ShapeDtypeStruct((D_OUT, b_pad), jnp.bfloat16),
        grid=(n_tiles,),
        in_specs=[
            pl.BlockSpec((D_IN, tile_b), lambda i: (0, i)),   # streamed x tile
            pl.BlockSpec((H, D_IN), lambda i: (0, 0)),        # resident weights
            pl.BlockSpec((H, 1), lambda i: (0, 0)),
            pl.BlockSpec((H, H), lambda i: (0, 0)),
            pl.BlockSpec((H, 1), lambda i: (0, 0)),
            pl.BlockSpec((D_OUT, H), lambda i: (0, 0)),
            pl.BlockSpec((D_OUT, 1), lambda i: (0, 0)),
        ],
        out_specs=pl.BlockSpec((D_OUT, tile_b), lambda i: (0, i)),
        compiler_params=pltpu.CompilerParams(
            dimension_semantics=("parallel",)
        ),
        cost_estimate=cost,
    )(
        xt,
        pp["w1t"], pp["b1"],
        pp["w2t"], pp["b2"],
        pp["w3t"], pp["b3"],
    )


@functools.partial(jax.jit, static_argnames=("tile_b", "max_tile"))
def ffnnc_forward(x, params, tile_b=None, max_tile=_MAX_TILE_B):
    """Standard layout: x [B, D_IN] f32 -> [B, D_OUT] f32.

    The pad + bf16 cast + transpose on each side run under this jit so XLA
    fuses them into single copies around the pallas_call.
    """
    B = x.shape[0]
    b_pad = _round_up(max(B, 1), _LANE)
    xt = jnp.pad(x, ((0, b_pad - B), (0, 0))).astype(jnp.bfloat16).T  # [D_IN, b_pad]
    out_t = _ffnnc_core(xt, _cast_params(params), tile_b, max_tile)
    return out_t.T[:B].astype(jnp.float32)


@functools.partial(jax.jit, static_argnames=("tile_b", "max_tile"))
def ffnnc_forward_t(xt, params, tile_b=None, max_tile=_MAX_TILE_B):
    """Layout-negotiated entry: xt [D_IN, B_pad] (B_pad % 128 == 0),
    returns [D_OUT, B_pad] bf16 — no wrapper transposes at all."""
    return _ffnnc_core(xt.astype(jnp.bfloat16), _cast_params(params),
                       tile_b, max_tile)


def init_params(key):
    """PyTorch nn.Linear default init: U(-1/sqrt(fan_in), 1/sqrt(fan_in)).
    Weights in PyTorch-native [out_features, in_features]; biases as [out, 1]."""
    ks = jax.random.split(key, 6)

    def lin(kw, kb, fan_in, fan_out):
        bound = 1.0 / math.sqrt(fan_in)
        wt = jax.random.uniform(kw, (fan_out, fan_in), jnp.float32, -bound, bound)
        b = jax.random.uniform(kb, (fan_out, 1), jnp.float32, -bound, bound)
        return wt, b

    w1t, b1 = lin(ks[0], ks[1], D_IN, H)
    w2t, b2 = lin(ks[2], ks[3], H, H)
    w3t, b3 = lin(ks[4], ks[5], H, D_OUT)
    return {"w1t": w1t, "b1": b1, "w2t": w2t, "b2": b2, "w3t": w3t, "b3": b3}


def reference_forward(x, p):
    """Pure-f32 reference (the original module's semantics)."""
    hi = jax.lax.Precision.HIGHEST
    h1 = jnp.tanh(jnp.dot(x, p["w1t"].T, precision=hi) + p["b1"][:, 0])
    h2 = jnp.tanh(jnp.dot(h1, p["w2t"].T, precision=hi) + p["b2"][:, 0])
    return jnp.dot(h2, p["w3t"].T, precision=hi) + p["b3"][:, 0]


def reference_forward_quantized(x, p):
    """Reference that applies the same bf16 casts the kernel does (f32 math)."""
    hi = jax.lax.Precision.HIGHEST
    f32 = jnp.float32
    q = lambda a: a.astype(jnp.bfloat16).astype(f32)
    xb = q(x)
    w1, w2, w3 = q(p["w1t"]), q(p["w2t"]), q(p["w3t"])
    h1 = q(jnp.tanh(jnp.dot(xb, w1.T, precision=hi) + p["b1"][:, 0]))
    h2 = q(jnp.tanh(jnp.dot(h1, w2.T, precision=hi) + p["b2"][:, 0]))
    out = jnp.dot(h2, w3.T, precision=hi) + p["b3"][:, 0]
    return q(out)


if __name__ == "__main__":
    key = jax.random.PRNGKey(0)
    k_param, k_x1, k_x2 = jax.random.split(key, 3)
    params = init_params(k_param)

    # Small test (B=8 pads to a single 128-lane tile).
    B = 8
    x = jax.random.normal(k_x1, (B, D_IN), dtype=jnp.float32)
    out = jax.block_until_ready(ffnnc_forward(x, params))
    assert out.shape == (B, D_OUT) and out.dtype == jnp.float32
    ref_q = reference_forward_quantized(x, params)
    ref_f = reference_forward(x, params)
    # Tight check vs the bf16-matched reference; loose check vs pure-f32
    # semantics (drift is the expected cost of bf16 I/O).
    assert jnp.allclose(out, ref_q, atol=2e-2, rtol=2e-2), "mismatch vs quantized ref (B=8)"
    assert jnp.allclose(out, ref_f, atol=5e-2, rtol=5e-2), "mismatch vs f32 ref (B=8)"

    # Multi-tile test: B=300 pads to 384 (128-granularity), tile_b=128 -> 3 grid
    # steps, exercising the batch grid and the padded-tail path.
    B2 = 300
    x2 = jax.random.normal(k_x2, (B2, D_IN), dtype=jnp.float32)
    out2 = jax.block_until_ready(ffnnc_forward(x2, params, tile_b=128))
    assert out2.shape == (B2, D_OUT)
    ref_q2 = reference_forward_quantized(x2, params)
    ref_f2 = reference_forward(x2, params)
    assert jnp.allclose(out2, ref_q2, atol=2e-2, rtol=2e-2), "mismatch vs quantized ref (B=300)"
    assert jnp.allclose(out2, ref_f2, atol=5e-2, rtol=5e-2), "mismatch vs f32 ref (B=300)"

    # Layout-negotiated path: caller supplies [D_IN, B_pad], gets [D_OUT, B_pad]
    # back — no wrapper transposes at all.
    b_pad2 = _round_up(B2, _LANE)
    xt2 = jnp.pad(x2, ((0, b_pad2 - B2), (0, 0))).T
    out_t2 = jax.block_until_ready(ffnnc_forward_t(xt2, params))
    assert out_t2.shape == (D_OUT, b_pad2) and out_t2.dtype == jnp.bfloat16
    assert jnp.allclose(out_t2[:, :B2].T.astype(jnp.float32), ref_q2,
                        atol=2e-2, rtol=2e-2), "mismatch vs quantized ref (transposed entry)"

    print("KERNEL_OK")
</pallas_src>

<mosaic_0001>
module attributes {stable_mosaic.version = 11 : i64} {
  func.func @ffnnc_kernel(%arg0: i32, %arg1: memref<6x128xbf16, #tpu.memory_space<vmem>>, %arg2: memref<20x6xbf16, #tpu.memory_space<vmem>>, %arg3: memref<20x1xf32, #tpu.memory_space<vmem>>, %arg4: memref<20x20xbf16, #tpu.memory_space<vmem>>, %arg5: memref<20x1xf32, #tpu.memory_space<vmem>>, %arg6: memref<8x20xbf16, #tpu.memory_space<vmem>>, %arg7: memref<8x1xf32, #tpu.memory_space<vmem>>, %arg8: memref<8x128xbf16, #tpu.memory_space<vmem>>) attributes {dimension_semantics = [#tpu.dimension_semantics<parallel>], iteration_bounds = array<i64: 1>, scalar_prefetch = 0 : i64, scratch_operands = 0 : i64, tpu.core_type = #tpu.core_type<tc>, window_params = [{transform_indices = @transform_0, window_bounds = array<i64: 6, 128>}, {pipeline_mode = #tpu.pipeline_mode<synchronous>, transform_indices = @transform_1, window_bounds = array<i64: 20, 6>}, {pipeline_mode = #tpu.pipeline_mode<synchronous>, transform_indices = @transform_2, window_bounds = array<i64: 20, 1>}, {pipeline_mode = #tpu.pipeline_mode<synchronous>, transform_indices = @transform_3, window_bounds = array<i64: 20, 20>}, {pipeline_mode = #tpu.pipeline_mode<synchronous>, transform_indices = @transform_4, window_bounds = array<i64: 20, 1>}, {pipeline_mode = #tpu.pipeline_mode<synchronous>, transform_indices = @transform_5, window_bounds = array<i64: 8, 20>}, {pipeline_mode = #tpu.pipeline_mode<synchronous>, transform_indices = @transform_6, window_bounds = array<i64: 8, 1>}, {transform_indices = @transform_7, window_bounds = array<i64: 8, 128>}]} {
    %c0 = arith.constant 0 : index
    %c0_0 = arith.constant 0 : index
    %0 = vector.load %arg1[%c0, %c0_0] : memref<6x128xbf16, #tpu.memory_space<vmem>>, vector<6x128xbf16>
    %c0_1 = arith.constant 0 : index
    %c0_2 = arith.constant 0 : index
    %1 = vector.load %arg3[%c0_1, %c0_2] : memref<20x1xf32, #tpu.memory_space<vmem>>, vector<20x1xf32>
    %c0_3 = arith.constant 0 : index
    %c0_4 = arith.constant 0 : index
    %2 = vector.load %arg5[%c0_3, %c0_4] : memref<20x1xf32, #tpu.memory_space<vmem>>, vector<20x1xf32>
    %c0_5 = arith.constant 0 : index
    %c0_6 = arith.constant 0 : index
    %3 = vector.load %arg7[%c0_5, %c0_6] : memref<8x1xf32, #tpu.memory_space<vmem>>, vector<8x1xf32>
    %c0_7 = arith.constant 0 : index
    %c0_8 = arith.constant 0 : index
    %4 = vector.load %arg2[%c0_7, %c0_8] : memref<20x6xbf16, #tpu.memory_space<vmem>>, vector<20x6xbf16>
    %cst = arith.constant dense<0.000000e+00> : vector<20x128xf32>
    %5 = tpu.matmul %4, %0, %cst {dimension_numbers = #tpu.dot_dimension_numbers<[1], [0], [0], [1], [0, 0, 1, 1], [], []>} : vector<20x6xbf16>, vector<6x128xbf16>, vector<20x128xf32> -> vector<20x128xf32>
    %6 = vector.broadcast %1 : vector<20x1xf32> to vector<20x128xf32>
    %7 = arith.addf %5, %6 : vector<20x128xf32>
    %8 = math.tanh %7 : vector<20x128xf32>
    %9 = arith.truncf %8 : vector<20x128xf32> to vector<20x128xbf16>
    %c0_9 = arith.constant 0 : index
    %c0_10 = arith.constant 0 : index
    %10 = vector.load %arg4[%c0_9, %c0_10] : memref<20x20xbf16, #tpu.memory_space<vmem>>, vector<20x20xbf16>
    %cst_11 = arith.constant dense<0.000000e+00> : vector<20x128xf32>
    %11 = tpu.matmul %10, %9, %cst_11 {dimension_numbers = #tpu.dot_dimension_numbers<[1], [0], [0], [1], [0, 0, 1, 1], [], []>} : vector<20x20xbf16>, vector<20x128xbf16>, vector<20x128xf32> -> vector<20x128xf32>
    %12 = vector.broadcast %2 : vector<20x1xf32> to vector<20x128xf32>
    %13 = arith.addf %11, %12 : vector<20x128xf32>
    %14 = math.tanh %13 : vector<20x128xf32>
    %15 = arith.truncf %14 : vector<20x128xf32> to vector<20x128xbf16>
    %c0_12 = arith.constant 0 : index
    %c0_13 = arith.constant 0 : index
    %16 = vector.load %arg6[%c0_12, %c0_13] : memref<8x20xbf16, #tpu.memory_space<vmem>>, vector<8x20xbf16>
    %cst_14 = arith.constant dense<0.000000e+00> : vector<8x128xf32>
    %17 = tpu.matmul %16, %15, %cst_14 {dimension_numbers = #tpu.dot_dimension_numbers<[1], [0], [0], [1], [0, 0, 1, 1], [], []>} : vector<8x20xbf16>, vector<20x128xbf16>, vector<8x128xf32> -> vector<8x128xf32>
    %18 = vector.broadcast %3 : vector<8x1xf32> to vector<8x128xf32>
    %19 = arith.addf %17, %18 : vector<8x128xf32>
    %20 = arith.truncf %19 : vector<8x128xf32> to vector<8x128xbf16>
    %c0_15 = arith.constant 0 : index
    %c0_16 = arith.constant 0 : index
    %21 = vector.load %arg8[%c0_15, %c0_16] : memref<8x128xbf16, #tpu.memory_space<vmem>>, vector<8x128xbf16>
    tpu.vector_store %arg8[%c0_15, %c0_16], %20 {strides = array<i32>} : memref<8x128xbf16, #tpu.memory_space<vmem>>, vector<8x128xbf16>,
    return
  }
  func.func @transform_0(%arg0: i32) -> (i32, i32) {
    %c0_i32 = arith.constant 0 : i32
    %c0_i32_0 = arith.constant 0 : i32
    return %c0_i32, %arg0 : i32, i32
  }
  func.func @transform_1(%arg0: i32) -> (i32, i32) {
    %c0_i32 = arith.constant 0 : i32
    %c0_i32_0 = arith.constant 0 : i32
    %c0_i32_1 = arith.constant 0 : i32
    return %c0_i32, %c0_i32_0 : i32, i32
  }
  func.func @transform_2(%arg0: i32) -> (i32, i32) {
    %c0_i32 = arith.constant 0 : i32
    %c0_i32_0 = arith.constant 0 : i32
    %c0_i32_1 = arith.constant 0 : i32
    return %c0_i32, %c0_i32_0 : i32, i32
  }
  func.func @transform_3(%arg0: i32) -> (i32, i32) {
    %c0_i32 = arith.constant 0 : i32
    %c0_i32_0 = arith.constant 0 : i32
    %c0_i32_1 = arith.constant 0 : i32
    return %c0_i32, %c0_i32_0 : i32, i32
  }
  func.func @transform_4(%arg0: i32) -> (i32, i32) {
    %c0_i32 = arith.constant 0 : i32
    %c0_i32_0 = arith.constant 0 : i32
    %c0_i32_1 = arith.constant 0 : i32
    return %c0_i32, %c0_i32_0 : i32, i32
  }
  func.func @transform_5(%arg0: i32) -> (i32, i32) {
    %c0_i32 = arith.constant 0 : i32
    %c0_i32_0 = arith.constant 0 : i32
    %c0_i32_1 = arith.constant 0 : i32
    return %c0_i32, %c0_i32_0 : i32, i32
  }
  func.func @transform_6(%arg0: i32) -> (i32, i32) {
    %c0_i32 = arith.constant 0 : i32
    %c0_i32_0 = arith.constant 0 : i32
    %c0_i32_1 = arith.constant 0 : i32
    return %c0_i32, %c0_i32_0 : i32, i32
  }
  func.func @transform_7(%arg0: i32) -> (i32, i32) {
    %c0_i32 = arith.constant 0 : i32
    %c0_i32_0 = arith.constant 0 : i32
    return %c0_i32, %arg0 : i32, i32
  }
}

</mosaic_0001>

<bundles_post_ra>
// kernel: ffnnc_forward.1
= control target key start
LH: loop header
LB: loop body
LE: loop exit
PB: predicated region body
PF: predicated region fallthrough
CT: control target
= control target key end

     0   :  { %vm68_vm0 = vcmask 1042432   ;;  %vm61_vm1 = vcmask 48128   ;;  %v337_v1 = vmov 0   ;;  %vm151_vm2 = vcmask 162816   ;;  %s430_s0 = inlined_call_operand.vmem [shape: bf16[6,128], index: 0, kind: input, shape index: {}]   ;;  %s431_s1 = inlined_call_operand.vmem [shape: bf16[20,6], index: 1, kind: input, shape index: {}]   ;;  %s432_s2 = inlined_call_operand.vmem [shape: f32[20,1], index: 2, kind: input, shape index: {}]   ;;  %s433_s4 = inlined_call_operand.vmem [shape: f32[20,1], index: 4, kind: input, shape index: {}]   ;;  %s434_s6 = inlined_call_operand.vmem [shape: f32[8,1], index: 6, kind: input, shape index: {}]   ;;  %s435_s3 = inlined_call_operand.vmem [shape: bf16[20,20], index: 3, kind: input, shape index: {}]   ;;  %s436_s5 = inlined_call_operand.vmem [shape: bf16[8,20], index: 5, kind: input, shape index: {}]   ;;  %s437_s7 = inlined_call_operand.vmem [shape: bf16[8,128], index: 7, kind: output, shape index: {}]  }
   0x1   :  { %v27_v0 = vld [vmem:[%s430_s0] sm:$0x7]  ;;  %319 = vset.pattern.permute.xlu0 %v337_v1  ;;  %320 = vset.pattern.permute.xlu1 %v337_v1  ;;  %v30_v4 = vld [vmem:[%s432_s2 + $0x10] sm:$0xf]  ;;  %v29_v6 = vld [vmem:[%s432_s2 + $0x8] sm:$0xff]  ;;  %vm158_vm3 = vcmask 1041408  }
   0x2   :  { %314 = vmatprep.subr.msk.bf16.mxu0 %vm68_vm0, %v27_v0  ;;  %v70_v2 = vsel %vm68_vm0, %v27_v0, 0  ;;  %v321_v3 = vld [vmem:[%s431_s1] sm:$0xff]   ;;  %v322_v5 = vld [vmem:[%s431_s1 + $0x8] ss:$0 sps:$4 sm:$0x33]   ;;  %50 = vperm.xlu0 %319, %v30_v4   ;;  %v338_v30 = vmov 0.0  }
   0x3   :  { %293 = vmatpush3.bf16.msra.mxu0 %v70_v2  ;;  %294 = vmatprep.mubr.msk.bf16.mxu0 %vm61_vm1, %v321_v3  ;;  %v28_v7 = vld [vmem:[%s432_s2] sm:$0xff]  ;;  %v33_v8 = vld [vmem:[%s433_s4 + $0x10] sm:$0xf]  ;;  %v32_v10 = vld [vmem:[%s433_s4 + $0x8] sm:$0xff]  ;;  %vm339_vm4 = vmmov 0  }
   0x4   :  { %45 = vperm.xlu1 %320, %v29_v6   ;;  %v31_v9 = vld [vmem:[%s433_s4] sm:$0xff]  ;;  %v324_v29 = vld [vmem:[%s435_s3 + $0x8] ss:$0 sps:$4 sm:$0x33]   ;;  %306 = vmatprep.subr.bf16.mxu0 %v338_v30 }
   0x5   :  { %v34_v11 = vld [vmem:[%s434_s6] sm:$0xff] }
   0x6   :  { %295 = vmatmul.mubr.msk.bf16.vlgmr.msra.gmra.mxu0 %vm61_vm1, %v322_v5  ;;  %40 = vperm.xlu0 %319, %v28_v7   ;;  %v323_v12 = vld [vmem:[%s435_s3] sm:$0xff]  }
   0x7   :  { %302 = vmatprep.mubr.msk.bf16.mxu1 %vm151_vm2, %v323_v12  ;;  %310 = vmatprep.mubr.msk.bf16.mxu0 %vm339_vm4, %v338_v30  ;;  %v215_v47 = vld [vmem:[%s436_s5] sm:$0xf] }
   0x8   :  { %140 = vperm.xlu1 %320, %v33_v8  }
   0xa   :  { %130 = vperm.xlu0 %319, %v31_v9  }
   0xc   :  { %135 = vperm.xlu1 %320, %v32_v10  }
   0xe   :  { %218 = vperm.xlu0 %319, %v34_v11  }
  0x7d   :  { %v51_v13 = vpop.permute.xlu0 %50 }
  0x7f   :  { %v46_v20 = vpop.permute.xlu1 %45 }
  0x81   :  { %v41_v17 = vpop.permute.xlu0 %40 }
  0x83   :  { %v141_v31 = vpop.permute.xlu1 %140 }
  0x85   :  { %v131_v35 = vpop.permute.xlu0 %130 }
  0x87   :  { %v136_v38 = vpop.permute.xlu1 %135 }
  0x89   :  { %v219_v48 = vpop.permute.xlu0 %218 }
  0xc6   :  { %v296_v14 = vpop.f32.mrf.mxu0 }
  0xc7   :  { %v115_v15 = vadd.f32 %v296_v14, %v51_v13 }
  0xc8   :  { %v106_v16 = vpop.f32.mrf.mxu0 }
  0xc9   :  { %325 = vtanh.f32 %v115_v15  ;;  %v107_v18 = vadd.f32 %v106_v16, %v41_v17 }
  0xca   :  { %v297_v19 = vpop.f32.mrf.mxu0 }
  0xcb   :  { %327 = vtanh.f32 %v107_v18 }
  0xcc   :  { %v109_v21 = vpop.f32.mrf.mxu0 }
  0xcd   :  { %v110_v22 = vadd.f32 %v109_v21, %v46_v20 }
  0xcf   :  { %329 = vtanh.f32 %v110_v22 }
  0xd6   :  { %v326_v23 = vpop.eup %325 }
  0xd7   :  { %v124_v24 = vpack.c.bf16 %v326_v23, %v326_v23 }
  0xd8   :  { %v328_v26 = vpop.eup %327 }
  0xd9   :  { %315 = vmatprep.subr.msk.bf16.mxu1 %vm158_vm3, %v124_v24  ;;  %v160_v25 = vsel %vm158_vm3, %v124_v24, 0 }
  0xda   :  { %299 = vmatpush3.bf16.msra.mxu1 %v160_v25 }
  0xdc   :  { %v330_v27 = vpop.eup %329 }
  0xdd   :  { %v123_v28 = vpack.c.bf16 %v330_v27, %v328_v26 }
  0xdf   :  { %300 = vmatprep.subr.bf16.mxu1 %v123_v28 }
  0xe0   :  { %301 = vmatpush3.bf16.msra.mxu1 %v123_v28 }
  0xe3   :  { %303 = vmatmul.mubr.msk.bf16.vlgmr.msra.gmra.mxu1 %vm151_vm2, %v324_v29 }
 0x1a3   :  { %v304_v32 = vpop.f32.mrf.mxu1 }
 0x1a4   :  { %v205_v33 = vadd.f32 %v304_v32, %v141_v31 }
 0x1a5   :  { %v196_v34 = vpop.f32.mrf.mxu1 }
 0x1a6   :  { %331 = vtanh.f32 %v205_v33  ;;  %v197_v36 = vadd.f32 %v196_v34, %v131_v35 }
 0x1a7   :  { %v305_v37 = vpop.f32.mrf.mxu1 }
 0x1a8   :  { %333 = vtanh.f32 %v197_v36 }
 0x1a9   :  { %v199_v39 = vpop.f32.mrf.mxu1 }
 0x1aa   :  { %v200_v40 = vadd.f32 %v199_v39, %v136_v38 }
 0x1ac   :  { %335 = vtanh.f32 %v200_v40 }
 0x1b3   :  { %v332_v41 = vpop.eup %331 }
 0x1b4   :  { %v214_v42 = vpack.c.bf16 %v332_v41, %v332_v41 }
 0x1b5   :  { %v334_v44 = vpop.eup %333 }
 0x1b6   :  { %v225_v43 = vsel %vm158_vm3, %v214_v42, 0 }
 0x1b7   :  { %307 = vmatpush3.bf16.msra.mxu0 %v225_v43 }
 0x1b8   :  { %308 = vmatprep.subr.bf16.mxu0 %v338_v30 }
 0x1b9   :  { %v336_v45 = vpop.eup %335 }
 0x1ba   :  { %v213_v46 = vpack.c.bf16 %v336_v45, %v334_v44 }
 0x1bc   :  { %309 = vmatpush3.bf16.msra.mxu0 %v213_v46 }
 0x1bf   :  { %311 = vmatmul.mubr.msk.bf16.vlgmr.msra.gmra.mxu0 %vm151_vm2, %v215_v47 }
 0x27f   :  { %v261_v49 = vpop.f32.mrf.mxu0 }
 0x280   :  { %v262_v50 = vadd.f32 %v261_v49, %v219_v48 }
 0x281   :  { %v312_v51 = vpop.f32.mrf.mxu0 }
 0x282   :  { %v267_v52 = vpack.c.bf16 %v262_v50, %v262_v50 }
 0x283   :  { %v264_v53 = vpop.f32.mrf.mxu0 }
 0x284   :  { %268 = vst [vmem:[%s437_s7] sm:$0xf] %v267_v52 }
 0x285   :  { %v313_v54 = vpop.f32.mrf.mxu0 }

</bundles_post_ra>
